<compile_context>
chip_gen: v6e
topology: v6e:2x2x1
jax: 0.10.0
libtpu: 0.0.40
codegen_flags: <defaults>
</compile_context>

<pallas_src>
import functools

import jax
import jax.numpy as jnp
import numpy as np
from jax.experimental import pallas as pl
from jax.experimental.pallas import tpu as pltpu


def _ce_kernel(x_ref, t_ref, loss_ref, *, smooth, ignore_idx, gamma):
    # x_ref:    (V, TT)  logits tile (vocab on sublanes, time on lanes)
    # t_ref:    (1, TT)  int32 targets tile
    # loss_ref: (1, TT)  float32 per-position loss tile (lane-dense)
    x = x_ref[...].astype(jnp.float32)                       # (V, TT)
    t = t_ref[...]                                           # (1, TT)
    V = x.shape[0]

    # log-sum-exp over the vocab (sublane) axis, max-stabilized
    m = jnp.max(x, axis=0, keepdims=True)                    # (1, TT)
    se = jnp.sum(jnp.exp(x - m), axis=0, keepdims=True)      # (1, TT)
    lse = jnp.log(se) + m                                    # (1, TT)

    # gather the target-class logit via one-hot select (no lsm materialized)
    cls = jax.lax.broadcasted_iota(jnp.int32, x.shape, 0)    # (V, TT) class ids
    onehot = cls == t                                        # broadcast over sublanes
    tgt_x = jnp.sum(jnp.where(onehot, x, 0.0), axis=0, keepdims=True)  # (1, TT)

    tgt_lsm = tgt_x - lse                                    # log_softmax at target
    nll = -tgt_lsm                                           # nll_loss, reduction='none'
    valid = (t != ignore_idx).astype(jnp.float32)            # (1, TT)

    if smooth > 0.0:
        # mean over non-target classes of -lsm:
        #   sum_c lsm[c] = sum_c x[c] - V*lse
        #   sum_{c != y}(-lsm[c]) = -(sum_c lsm[c]) + lsm[y]
        sum_x = jnp.sum(x, axis=0, keepdims=True)            # (1, TT)
        sum_lsm = sum_x - float(V) * lse
        mean_other = (-sum_lsm + tgt_lsm) / float(V - 1)
        loss = nll * (1.0 - smooth) + mean_other * smooth
    else:
        loss = nll
    loss = loss * valid                                      # zero ignored positions

    if gamma > 0.0:
        # ignored rows have loss==0 already, so the (possibly garbage) p_tgt
        # there is harmless.
        p_tgt = jnp.exp(tgt_lsm)                             # softmax prob of target
        loss = loss * (1.0 - p_tgt) ** gamma

    loss_ref[...] = loss


def cross_entropy_pallas(logits, target, *, vocab_size, smooth=0.1,
                         ignore_idx=-1, gamma=0.0, tile_t=None,
                         max_block_bytes=8 << 20):
    """logits: (B, V, T) float; target: (B, T) int. Returns loss (B, T) float32."""
    B, V, T = logits.shape
    assert V == vocab_size
    assert V > 1, "label smoothing divides by (V - 1)"

    itemsize = jnp.dtype(logits.dtype).itemsize

    # Pick a lane tile over T: a multiple of 128, big enough to amortize
    # per-step overhead, small enough that the (V, tile_t) logits block (double
    # buffered) stays within a conservative VMEM budget on every generation.
    if tile_t is None:
        cap = max(128, (max_block_bytes // (V * itemsize)) // 128 * 128)
        tile_t = int(min(cap, pl.cdiv(T, 128) * 128))
    # TODO(synk): for very large vocabularies (V * tile_t * itemsize >> VMEM
    # budget) add an inner 'arbitrary' vocab grid axis with an online
    # logsumexp (flash-style) instead of shrinking tile_t.

    # Remainder handling: pad T up to a multiple of tile_t; padded positions get
    # target == ignore_idx so their loss is exactly 0 and is sliced off below.
    T_pad = int(pl.cdiv(T, tile_t) * tile_t)
    if T_pad != T:
        logits = jnp.pad(logits, ((0, 0), (0, 0), (0, T_pad - T)))
        target = jnp.pad(target, ((0, 0), (0, T_pad - T)),
                         constant_values=ignore_idx)

    # (B, T) -> (B, 1, T): free reshape so target/loss blocks are (1, tile_t)
    # (lane-dense, sublane dim == full array dim).
    t3 = target.reshape(B, 1, T_pad).astype(jnp.int32)

    kernel = functools.partial(_ce_kernel, smooth=float(smooth),
                               ignore_idx=int(ignore_idx), gamma=float(gamma))

    block_bytes = V * tile_t * itemsize
    # 2x for double buffering of the logits block + headroom for in-kernel
    # temporaries; clamp so we never ask for more than v7x can give.
    vmem_limit = int(min(max(4 * block_bytes + (2 << 20), 16 << 20), 48 << 20))

    grid = (B, T_pad // tile_t)
    loss3 = pl.pallas_call(
        kernel,
        out_shape=jax.ShapeDtypeStruct((B, 1, T_pad), jnp.float32),
        grid_spec=pltpu.PrefetchScalarGridSpec(
            num_scalar_prefetch=0,
            grid=grid,
            in_specs=[
                # native layout: batch squeezed, full vocab on sublanes,
                # tile_t time steps on lanes
                pl.BlockSpec((None, V, tile_t), lambda b, j: (b, 0, j)),
                pl.BlockSpec((None, 1, tile_t), lambda b, j: (b, 0, j)),
            ],
            out_specs=pl.BlockSpec((None, 1, tile_t), lambda b, j: (b, 0, j)),
        ),
        compiler_params=pltpu.CompilerParams(
            dimension_semantics=("parallel", "parallel"),
            vmem_limit_bytes=vmem_limit),
    )(logits, t3)

    loss = loss3.reshape(B, T_pad)
    if T_pad != T:
        loss = loss[:, :T]
    return loss


def _reference(logits, target, *, smooth, ignore_idx, gamma):
    """Pure-JAX reference mirroring the PyTorch forward."""
    B, V, T = logits.shape
    lsm = jax.nn.log_softmax(logits.astype(jnp.float32), axis=1)          # (B, V, T)
    tgt = target.astype(jnp.int32)
    safe_tgt = jnp.clip(tgt, 0, V - 1)
    tgt_lsm = jnp.take_along_axis(lsm, safe_tgt[:, None, :], axis=1)[:, 0, :]  # (B, T)
    nll = -tgt_lsm
    valid = (tgt != ignore_idx).astype(jnp.float32)
    if smooth > 0.0:
        sum_neg = -jnp.sum(lsm, axis=1)                                   # (B, T)
        mean_other = (sum_neg + tgt_lsm) / (V - 1)
        loss = nll * (1.0 - smooth) + mean_other * smooth
    else:
        loss = nll
    loss = loss * valid
    if gamma > 0.0:
        p_tgt = jnp.exp(tgt_lsm)
        loss = loss * (1.0 - p_tgt) ** gamma
    return loss


if __name__ == "__main__":
    # small deterministic example: vocab of 32 tokens, batch=2, seq=200
    # (200 is deliberately NOT a multiple of the 128-lane tile to exercise the
    #  padding / ignore-masking path)
    B, T, V = 2, 200, 32
    vocab = {f"tok{i}": i for i in range(V)}   # the module's vocab dict (size only matters)

    key = jax.random.PRNGKey(0)
    k1, k2 = jax.random.split(key)
    logits = jax.random.normal(k1, (B, V, T), dtype=jnp.float32)      # (B, vocab, T)
    target = jax.random.randint(k2, (B, T), 0, V, dtype=jnp.int32)    # (B, T)

    # default module config: smooth=0.1, gamma=0.0
    loss = cross_entropy_pallas(
        logits, target, vocab_size=len(vocab),
        smooth=0.1, ignore_idx=-1, gamma=0.0, tile_t=128)
    loss = jax.block_until_ready(loss)
    ref = _reference(logits, target, smooth=0.1, ignore_idx=-1, gamma=0.0)
    np.testing.assert_allclose(np.asarray(loss), np.asarray(ref),
                               rtol=1e-5, atol=1e-4)

    # focal variant (gamma > 0) exercises the extra branch
    loss_f = cross_entropy_pallas(
        logits, target, vocab_size=len(vocab),
        smooth=0.1, ignore_idx=-1, gamma=2.0, tile_t=128)
    loss_f = jax.block_until_ready(loss_f)
    ref_f = _reference(logits, target, smooth=0.1, ignore_idx=-1, gamma=2.0)
    np.testing.assert_allclose(np.asarray(loss_f), np.asarray(ref_f),
                               rtol=1e-5, atol=1e-4)

    print("KERNEL_OK")
</pallas_src>

<mosaic_0001>
module attributes {stable_mosaic.version = 11 : i64} {
  func.func @_ce_kernel(%arg0: i32, %arg1: i32, %arg2: memref<1x32x128xf32, #tpu.memory_space<vmem>>, %arg3: memref<1x1x128xi32, #tpu.memory_space<vmem>>, %arg4: memref<1x1x128xf32, #tpu.memory_space<vmem>>) attributes {dimension_semantics = [#tpu.dimension_semantics<parallel>, #tpu.dimension_semantics<parallel>], iteration_bounds = array<i64: 2, 2>, scalar_prefetch = 0 : i64, scratch_operands = 0 : i64, tpu.core_type = #tpu.core_type<tc>, window_params = [{transform_indices = @transform_0, window_bounds = array<i64: 1, 32, 128>}, {transform_indices = @transform_1, window_bounds = array<i64: 1, 1, 128>}, {transform_indices = @transform_2, window_bounds = array<i64: 1, 1, 128>}]} {
    %c0 = arith.constant 0 : index
    %c0_0 = arith.constant 0 : index
    %c0_1 = arith.constant 0 : index
    %0 = vector.load %arg2[%c0, %c0_0, %c0_1] : memref<1x32x128xf32, #tpu.memory_space<vmem>>, vector<1x32x128xf32>
    %1 = vector.shape_cast %0 : vector<1x32x128xf32> to vector<32x128xf32>
    %c0_2 = arith.constant 0 : index
    %c0_3 = arith.constant 0 : index
    %c0_4 = arith.constant 0 : index
    %2 = vector.load %arg3[%c0_2, %c0_3, %c0_4] : memref<1x1x128xi32, #tpu.memory_space<vmem>>, vector<1x1x128xi32>
    %3 = vector.shape_cast %2 : vector<1x1x128xi32> to vector<1x128xi32>
    %cst = arith.constant dense<0xFF800000> : vector<128xf32>
    %4 = vector.multi_reduction <maximumf>, %1, %cst [0] : vector<32x128xf32> to vector<128xf32>
    %5 = vector.shape_cast %4 : vector<128xf32> to vector<1x128xf32>
    %6 = vector.broadcast %5 : vector<1x128xf32> to vector<32x128xf32>
    %7 = arith.subf %1, %6 : vector<32x128xf32>
    %8 = math.exp %7 : vector<32x128xf32>
    %cst_5 = arith.constant dense<0.000000e+00> : vector<128xf32>
    %9 = vector.multi_reduction <add>, %8, %cst_5 [0] : vector<32x128xf32> to vector<128xf32>
    %10 = vector.shape_cast %9 : vector<128xf32> to vector<1x128xf32>
    %11 = math.log %10 : vector<1x128xf32>
    %12 = arith.addf %11, %5 : vector<1x128xf32>
    %13 = tpu.iota {dimensions = array<i32: 0>} : vector<32x128xi32>
    %14 = vector.broadcast %3 : vector<1x128xi32> to vector<32x128xi32>
    %15 = arith.cmpi eq, %13, %14 : vector<32x128xi32>
    %cst_6 = arith.constant 0.000000e+00 : f32
    %16 = vector.broadcast %cst_6 : f32 to vector<32x128xf32>
    %17 = arith.select %15, %1, %16 : vector<32x128xi1>, vector<32x128xf32>
    %cst_7 = arith.constant dense<0.000000e+00> : vector<128xf32>
    %18 = vector.multi_reduction <add>, %17, %cst_7 [0] : vector<32x128xf32> to vector<128xf32>
    %19 = vector.shape_cast %18 : vector<128xf32> to vector<1x128xf32>
    %20 = arith.subf %19, %12 : vector<1x128xf32>
    %cst_8 = arith.constant 0.000000e+00 : f32
    %21 = vector.broadcast %cst_8 : f32 to vector<1x128xf32>
    %22 = arith.subf %21, %20 : vector<1x128xf32>
    %c-1_i32 = arith.constant -1 : i32
    %23 = vector.broadcast %c-1_i32 : i32 to vector<1x128xi32>
    %24 = arith.cmpi ne, %3, %23 : vector<1x128xi32>
    %25 = arith.extui %24 : vector<1x128xi1> to vector<1x128xi32>
    %26 = arith.sitofp %25 : vector<1x128xi32> to vector<1x128xf32>
    %cst_9 = arith.constant dense<0.000000e+00> : vector<128xf32>
    %27 = vector.multi_reduction <add>, %1, %cst_9 [0] : vector<32x128xf32> to vector<128xf32>
    %28 = vector.shape_cast %27 : vector<128xf32> to vector<1x128xf32>
    %cst_10 = arith.constant 3.200000e+01 : f32
    %29 = vector.broadcast %cst_10 : f32 to vector<1x128xf32>
    %30 = arith.mulf %29, %12 : vector<1x128xf32>
    %31 = arith.subf %28, %30 : vector<1x128xf32>
    %cst_11 = arith.constant 0.000000e+00 : f32
    %32 = vector.broadcast %cst_11 : f32 to vector<1x128xf32>
    %33 = arith.subf %32, %31 : vector<1x128xf32>
    %34 = arith.addf %33, %20 : vector<1x128xf32>
    %cst_12 = arith.constant 3.100000e+01 : f32
    %35 = vector.broadcast %cst_12 : f32 to vector<1x128xf32>
    %36 = arith.divf %34, %35 : vector<1x128xf32>
    %cst_13 = arith.constant 0.899999976 : f32
    %37 = vector.broadcast %cst_13 : f32 to vector<1x128xf32>
    %38 = arith.mulf %22, %37 : vector<1x128xf32>
    %cst_14 = arith.constant 1.000000e-01 : f32
    %39 = vector.broadcast %cst_14 : f32 to vector<1x128xf32>
    %40 = arith.mulf %36, %39 : vector<1x128xf32>
    %41 = arith.addf %38, %40 : vector<1x128xf32>
    %42 = arith.mulf %41, %26 : vector<1x128xf32>
    %c0_15 = arith.constant 0 : index
    %c0_16 = arith.constant 0 : index
    %c0_17 = arith.constant 0 : index
    %43 = vector.load %arg4[%c0_15, %c0_16, %c0_17] : memref<1x1x128xf32, #tpu.memory_space<vmem>>, vector<1x1x128xf32>
    %44 = vector.shape_cast %43 : vector<1x1x128xf32> to vector<1x128xf32>
    %45 = vector.shape_cast %42 : vector<1x128xf32> to vector<1x1x128xf32>
    tpu.vector_store %arg4[%c0_15, %c0_16, %c0_17], %45 {strides = array<i32>} : memref<1x1x128xf32, #tpu.memory_space<vmem>>, vector<1x1x128xf32>,
    return
  }
  func.func @transform_0(%arg0: i32, %arg1: i32) -> (i32, i32, i32) {
    %c0_i32 = arith.constant 0 : i32
    %c0_i32_0 = arith.constant 0 : i32
    return %arg0, %c0_i32, %arg1 : i32, i32, i32
  }
  func.func @transform_1(%arg0: i32, %arg1: i32) -> (i32, i32, i32) {
    %c0_i32 = arith.constant 0 : i32
    %c0_i32_0 = arith.constant 0 : i32
    return %arg0, %c0_i32, %arg1 : i32, i32, i32
  }
  func.func @transform_2(%arg0: i32, %arg1: i32) -> (i32, i32, i32) {
    %c0_i32 = arith.constant 0 : i32
    %c0_i32_0 = arith.constant 0 : i32
    return %arg0, %c0_i32, %arg1 : i32, i32, i32
  }
}

</mosaic_0001>

<bundles_post_ra>
// kernel: tpu_custom_call.1
= control target key start
LH: loop header
LB: loop body
LE: loop exit
PB: predicated region body
PF: predicated region fallthrough
CT: control target
= control target key end

     0   :  { %s902_s0 = inlined_call_operand.hbm [shape: f32[2,32,256], index: 0, kind: input, shape index: {}]   ;;  %s903_s1 = inlined_call_operand.hbm [shape: s32[2,1,256], index: 1, kind: input, shape index: {}]   ;;  %s904_s2 = inlined_call_operand.hbm [shape: f32[2,1,256], index: 2, kind: output, shape index: {}]  }
   0x1   :  { %908 = sst [smem:[#allocation15_spill]] %s902_s0 }
   0x2   :  { %7 = vsyncpa [#allocation3], 0 }
   0x3   :  { %9 = vsyncpa [#allocation3 + $0x1], 0 }
   0x4   :  { %10 = vsyncpa [#allocation6], 0 }
   0x5   :  { %12 = vsyncpa [#allocation6 + $0x1], 0 }
   0x6   :  { %13 = vsyncpa [#allocation4], 0 }
   0x7   :  { %15 = vsyncpa [#allocation4 + $0x1], 0  ;;  %s716_s9 = smov 0   ;;  %s718_s10 = smov 0  }
   0x8   :  { %s720_s11 = smov 0   ;;  %s722_s12 = smov 0  }
   0x9   :  { %s724_s13 = smov 0   ;;  %s726_s14 = smov 0  }
   0xa   :  { %s728_s15 = smov 0   ;;  %s730_s16 = smov 0  }
   0xb LB: > { %909 = sst [smem:[#allocation11_spill]] %s672_s11  ;;  %s423_s17 = sadd.s32 4294967295, %s692_s16   ;;  %s692_s16 = sphi %s730_s16, %s21_s16   ;;  %s688_s15 = sphi %s728_s15, %s929_s15   ;;  %s684_s14 = sphi %s726_s14, %s928_s14   ;;  %s680_s13 = sphi %s724_s13, %s927_s13   ;;  %s676_s12 = sphi %s722_s12, %s926_s12   ;;  %s672_s11 = sphi %s720_s11, %s921_s11   ;;  %s668_s10 = sphi %s718_s10, %s925_s10   ;;  %s664_s9 = sphi %s716_s9, %s924_s9  }
   0xc   : > { %s424_s18 = sadd.s32 4294967294, %s692_s16   ;;  %s30_s19 = sadd.s32 1, %s684_s14 }
   0xd   : > { %s33_s20 = sadd.s32 1, %s688_s15  ;;  %p31_p0 = scmp.ge.s32.totalorder %s30_s19, 2 }
   0xe   : > { %s42_s21 = sadd.s32 1, %s672_s11  ;;  %p49_p1 = scmp.ne.s32.totalorder %s672_s11, %s668_s10 }
   0xf   : > { %p50_p2 = scmp.eq.s32.totalorder %s692_s16, 0  ;;  %s931_s19 = smov (%p31_p0, %s30_s19), 0 }
  0x10   : > { %910 = sst [smem:[#allocation12_spill]] %s931_s19  ;;  %s933_s20 = smov (!%p31_p0, %s33_s20), %s688_s15 }
  0x11   : > { %s38_s22 = ssub.s32 %s684_s14, %s931_s19  ;;  %p769_p3 = por %p50_p2, %p49_p1 }
  0x12   : > { %p35_p4 = scmp.ge.s32.totalorder %s933_s20, 2  ;;  %p55_p5 = scmp.ne.s32.totalorder %s668_s10, %s664_s9 }
  0x13   : > { %p56_p6 = scmp.eq.s32.totalorder %s423_s17, 0  ;;  %p109_p7 = scmp.eq.s32.totalorder %s423_s17, 3 }
  0x14   : > { %s935_s20 = smov (%p35_p4, %s933_s20), 0  ;;  %p115_p10 = scmp.eq.s32.totalorder %s424_s18, 3 }
  0x15   : > { %912 = sst [smem:[#allocation13_spill]] %s935_s20  ;;  %p777_p8 = por %p56_p6, %p55_p5 }
  0x16   : > { %p781_p9 = por %p109_p7, %p49_p1  ;;  %s37_s26 = ssub.s32 %s688_s15, %s935_s20 }
  0x17   : > { %s39_s27 = sor.u32 %s38_s22, %s37_s26  ;;  %p787_p12 = por %p115_p10, %p55_p5 }
  0x18   : > { %p40_p11 = scmp.eq.s32.totalorder %s39_s27, 0  ;;  %p456_p13 = scmp.lt.s32.totalorder %s692_s16, 4 }
  0x19   : > { %s793_s29 = sand.u32 1, %s672_s11   ;;  %s428_s4 = sshll.u32 %s688_s15, 3 }
  0x1a   : > { %s796_s30 = scalar_select %p40_p11, %s672_s11, %s42_s21  }
  0x1b   : > { %s427_s3 = sshll.u32 %s793_s29, 5  ;;  %s144_s5 = sadd.s32 %s684_s14, %s428_s4 }
  0x1c   : > { %916 = sst [smem:[#allocation14_spill]] %s796_s30  ;;  %s139_s6 = scalar_lea.vmem [#allocation2], %s427_s3 }
  0x1d   : > { %s147_s7 = sshll.u32 %s139_s6, 4  ;;  %s429_s8 = sshll.u32 %s144_s5, 7  ;;  %s148_s7 = int_to_ptr.vmem [resolvable:$true] %s147_s7 }
  0x1e   : > { %s917_s0 = sld [smem:[#allocation15_spill]]  ;;  %p806_p0 = pnand %p456_p13, %p769_p3 }
  0x1f   : > { %s136_s21 = scalar_lea.sflag [#allocation3], %s793_s29  ;;  %s549_s27 = scalar_lea.vmem %s148_s7, 512 }
  0x20   : > { %p538_p1 = pneg %p806_p0  ;;  %p550_p2 = scmp.ne.s32.totalorder %s148_s7, %s549_s27 }
  0x21   : > { %s694_s3 = smov [#allocation2]  }
  0x22   : > { %p552_p4 = pnand %p550_p2, %p538_p1  ;;  %s554_s4 = sshll.u32 %s694_s3, 4  ;;  %s555_s4 = int_to_ptr.vmem [resolvable:$false] %s554_s4 }
  0x23   : > { %s556_s5 = scalar_lea.vmem %s555_s4, 1024  ;;  %p557_p6 = scmp.lt.s32.totalorder %s148_s7, %s555_s4 }
  0x24   : > { %s146_s22 = scalar_lea.hbm %s917_s0, %s429_s8  ;;  %p553_p5 = pneg %p552_p4 }
  0x25   : > { %p558_p3 = scmp.lt.s32.totalorder %s556_s5, %s549_s27 }
  0x27   : > { %p559_p7 = por %p558_p3, %p557_p6 }
  0x29   : > { %p560_p10 = pnand %p559_p7, %p553_p5 }
  0x2b   : > { %563 = shalt.err (!%p560_p10)
}
  0x2c   : > { %s695_s23 = smov 256   ;;  %s696_s6 = smov 128  }
  0x2d   : > { %s697_s8 = smov 8   ;;  %p432_p11 = scmp.ge.s32.totalorder %s692_s16, 1 }
  0x2e   : > { %448 = dma.hbm_to_vmem [thread:$0]  (!%p806_p0), %s146_s22, 512, %s148_s7, %s136_s21, %s695_s23, %s696_s6, %s697_s8  }
  0x2f   : > { %p174_p13 = scmp.lt.s32.totalorder %s692_s16, 5  ;;  %s430_s18 = sshll.u32 %s688_s15, 1 }
  0x30   : > { %s165_s27 = sadd.s32 %s684_s14, %s430_s18  ;;  %s160_s3 = scalar_lea.vmem [#allocation5], %s793_s29 }
  0x31   : > { %p820_p2 = pnand %p432_p11, %p174_p13  ;;  %s169_s4 = sshll.u32 %s160_s3, 4  ;;  %s170_s4 = int_to_ptr.vmem [resolvable:$true] %s169_s4 }
  0x32   : > { %s431_s5 = sshll.u32 %s165_s27, 4  ;;  %s158_s30 = scalar_lea.sflag [#allocation6], %s793_s29 }
  0x33   : > { %s167_s19 = scalar_lea.hbm %s903_s1, %s431_s5  ;;  %s577_s11 = scalar_lea.vmem %s170_s4, 16 }
  0x34   : > { %p578_p4 = scmp.ne.s32.totalorder %s170_s4, %s577_s11  ;;  %s698_s7 = smov [#allocation5]  }
  0x35   : > { %s582_s22 = sshll.u32 %s698_s7, 4  ;;  %s583_s22 = int_to_ptr.vmem [resolvable:$false] %s582_s22 }
  0x36   : > { %p580_p5 = pnand %p578_p4, %p538_p1  ;;  %s584_s21 = scalar_lea.vmem %s583_s22, 32 }
  0x37   : > { %p585_p3 = scmp.lt.s32.totalorder %s170_s4, %s583_s22  ;;  %p586_p7 = scmp.lt.s32.totalorder %s584_s21, %s577_s11 }
  0x38   : > { %p581_p6 = pneg %p580_p5 }
  0x39   : > { %p587_p10 = por %p586_p7, %p585_p3 }
  0x3b   : > { %p588_p11 = pnand %p587_p10, %p581_p6 }
  0x3d   : > { %591 = shalt.err (!%p588_p11)
}
  0x3e   : > { %451 = dma.hbm_to_vmem [thread:$0]  (!%p806_p0), %s167_s19, 16, %s170_s4, %s158_s30  }
  0x3f   : > { %178 = sbr.rel (%p820_p2) target bundleno = 173 (0xad), region = 28  ;;  %s839_s0 = sand.u32 (!%p820_p2), 1, %s668_s10  }
  0x40   : > { %s433_s20 = sshll.u32 (!%p820_p2), %s839_s0, 5  ;;  %s181_s29 = scalar_lea.sflag (!%p820_p2), [#allocation3], %s839_s0 }
  0x41   : > { %s184_s23 = scalar_lea.vmem (!%p820_p2), [#allocation2], %s433_s20 }
  0x44   : > { %651 = dma.done.wait (%p777_p8), %s181_s29, 512  }
  0x45   : > { %653 = vsyncadd (%p777_p8), %s181_s29, 4294966784  ;;  %s190_s11 = scalar_lea.sflag [#allocation6], %s839_s0  ;;  %s192_s19 = scalar_lea.vmem [#allocation5], %s839_s0 }
  0x46   : > { %655 = dma.done.wait (%p777_p8), %s190_s11, 16  }
  0x47   : > { %657 = vsyncadd (%p777_p8), %s190_s11, 4294967280  ;;  %v216_v0 = vld [vmem:[%s184_s23] sm:$0xff]  ;;  %v217_v1 = vld [vmem:[%s184_s23 + $0x8] sm:$0xff]  ;;  %v254_v13 = vlaneseq  ;;  %s435_s24 = sshll.u32 %s680_s13, 1  ;;  %s215_s26 = scalar_lea.vmem [#allocation7], %s839_s0 }
  0x48   : > { %v218_v2 = vld [vmem:[%s184_s23 + $0x10] sm:$0xff]  ;;  %v219_v3 = vld [vmem:[%s184_s23 + $0x18] sm:$0xff]  ;;  %v221_v4 = vmax.f32 %v216_v0, %v217_v1  ;;  %v220_v24 = vld [vmem:[%s192_s19] sm:$0x1]  ;;  %v285_v38 = vadd.f32 %v217_v1, %v216_v0  ;;  %s316_s30 = sadd.s32 %s676_s12, %s435_s24  ;;  %s320_s6 = sshll.u32 %s215_s26, 4  ;;  %s321_s6 = int_to_ptr.vmem [resolvable:$true] %s320_s6 }
  0x49   : > { %v222_v5 = vmax.f32 %v218_v2, %v219_v3  ;;  %v255_v22 = vshrl.u32 %v254_v13, 7  ;;  %vm282_vm4 = vcmp.ne.s32.totalorder %v220_v24, 4294967295  ;;  %v699_v13 = vmov 0.0   ;;  %s436_s8 = sshll.u32 %s316_s30, 4  ;;  %s306_s27 = scalar_lea.sflag [#allocation4], %s839_s0 }
  0x4a   : > { %v286_v43 = vadd.f32 %v285_v38, %v218_v2  ;;  %s318_s13 = scalar_lea.hbm %s904_s2, %s436_s8  ;;  %s592_s3 = scalar_lea.vmem %s321_s6, 16 }
  0x4b   : > { %v223_v6 = vmax.f32 %v221_v4, %v222_v5  ;;  %v261_v23 = vsub.s32 0, %v255_v22  ;;  %v256_v25 = vadd.s32 8, %v255_v22  ;;  %v257_v27 = vadd.s32 16, %v255_v22  ;;  %p593_p8 = scmp.ne.s32.totalorder %s321_s6, %s592_s3  ;;  %s700_s12 = smov [#allocation7]  }
  0x4c   : > { %v258_v34 = vadd.s32 24, %v255_v22  ;;  %v287_v48 = vadd.f32 %v286_v43, %v219_v3  ;;  %s596_s4 = sshll.u32 %s700_s12, 4  ;;  %s597_s4 = int_to_ptr.vmem [resolvable:$false] %s596_s4 }
  0x4d   : > { %v224_v7 = vrot.slane %v223_v6, 4  ;;  %v262_v26 = vrot.slane %v220_v24, %v261_v23  ;;  %p594_p0 = pnand %p593_p8, %p781_p9  ;;  %s598_s5 = scalar_lea.vmem %s597_s4, 32 }
  0x4e   : > { %v288_v52 = vrot.slane %v287_v48, 4  ;;  %p599_p13 = scmp.lt.s32.totalorder %s321_s6, %s597_s4  ;;  %p600_p2 = scmp.lt.s32.totalorder %s598_s5, %s592_s3 }
  0x4f   : > { %v225_v8 = vmax.f32 %v223_v6, %v224_v7  ;;  %vm263_vm0 = vcmp.eq.s32.totalorder %v255_v22, %v262_v26  ;;  %vm264_vm1 = vcmp.eq.s32.totalorder %v256_v25, %v262_v26  ;;  %vm265_vm2 = vcmp.eq.s32.totalorder %v257_v27, %v262_v26  ;;  %p595_p1 = pneg %p594_p0 }
  0x50   : > { %v267_v30 = vsel %vm263_vm0, %v216_v0, 0.0  ;;  %v268_v31 = vsel %vm264_vm1, %v217_v1, 0.0  ;;  %v269_v39 = vsel %vm265_vm2, %v218_v2, 0.0  ;;  %vm266_vm3 = vcmp.eq.s32.totalorder %v258_v34, %v262_v26  ;;  %p601_p4 = por %p600_p2, %p599_p13 }
  0x51   : > { %v226_v9 = vrot.slane %v225_v8, 2  ;;  %v271_v37 = vadd.f32 %v268_v31, %v267_v30  ;;  %v270_v44 = vsel %vm266_vm3, %v219_v3, 0.0  ;;  %v289_v55 = vadd.f32 %v288_v52, %v287_v48 }
  0x52   : > { %p602_p5 = pnand %p601_p4, %p595_p1 }
  0x53   : > { %v227_v10 = vmax.f32 %v225_v8, %v226_v9  ;;  %v272_v42 = vadd.f32 %v271_v37, %v269_v39  ;;  %v290_v57 = vrot.slane %v289_v55, 2 }
  0x55   : > { %v228_v11 = vrot.slane %v227_v10, 1  ;;  %v273_v47 = vadd.f32 %v272_v42, %v270_v44  ;;  %v291_v59 = vadd.f32 %v290_v57, %v289_v55 }
  0x57   : > { %v229_v12 = vmax.f32 %v227_v10, %v228_v11  ;;  %v274_v51 = vrot.slane %v273_v47, 4  ;;  %v292_v61 = vrot.slane %v291_v59, 1 }
  0x59   : > { %v230_v14 = vsub.f32 %v216_v0, %v229_v12  ;;  %v231_v15 = vsub.f32 %v217_v1, %v229_v12  ;;  %v232_v16 = vsub.f32 %v218_v2, %v229_v12  ;;  %v233_v17 = vsub.f32 %v219_v3, %v229_v12 }
  0x5a   : > { %v275_v54 = vadd.f32 %v274_v51, %v273_v47  ;;  %v293_v2 = vadd.f32 %v292_v61, %v291_v59 }
  0x5b   : > { %v234_v18 = vmul.f32 1.442695, %v230_v14  ;;  %v236_v19 = vmul.f32 1.442695, %v231_v15  ;;  %v238_v20 = vmul.f32 1.442695, %v232_v16 }
  0x5c   : > { %v240_v21 = vmul.f32 1.442695, %v233_v17  ;;  %v276_v56 = vrot.slane %v275_v54, 2  ;;  %v434_v14 = vsel %vm282_vm4, 1.0, %v699_v13 }
  0x5d   : > { %526 = vpow2.f32 %v234_v18 }
  0x5e   : > { %528 = vpow2.f32 %v236_v19  ;;  %v277_v58 = vadd.f32 %v276_v56, %v275_v54 }
  0x5f   : > { %530 = vpow2.f32 %v238_v20 }
  0x60   : > { %532 = vpow2.f32 %v240_v21  ;;  %v278_v60 = vrot.slane %v277_v58, 1 }
  0x62   : > { %v279_v1 = vadd.f32 %v278_v60, %v277_v58 }
  0x6a   : > { %v527_v28 = vpop.eup %526 }
  0x6b   : > { %v529_v29 = vpop.eup %528 }
  0x6c   : > { %v531_v32 = vpop.eup %530  ;;  %v242_v33 = vadd.f32 %v529_v29, %v527_v28 }
  0x6d   : > { %v533_v35 = vpop.eup %532 }
  0x6e   : > { %v243_v36 = vadd.f32 %v531_v32, %v242_v33 }
  0x70   : > { %v244_v40 = vadd.f32 %v533_v35, %v243_v36 }
  0x72   : > { %v245_v41 = vrot.slane %v244_v40, 4 }
  0x74   : > { %v246_v45 = vadd.f32 %v245_v41, %v244_v40 }
  0x76   : > { %v247_v46 = vrot.slane %v246_v45, 2 }
  0x78   : > { %v248_v49 = vadd.f32 %v247_v46, %v246_v45 }
  0x7a   : > { %v249_v50 = vrot.slane %v248_v49, 1 }
  0x7c   : > { %v250_v53 = vadd.f32 %v249_v50, %v248_v49 }
  0x7e   : > { %534 = vlog2.f32 %v250_v53 }
  0x8b   : > { %v535_v62 = vpop.eup %534 }
  0x8c   : > { %v252_v63 = vmul.f32 0.6931472, %v535_v62 }
  0x8e   : > { %v253_v0 = vadd.f32 %v252_v63, %v229_v12 }
  0x90   : > { %v294_v3 = vmul.f32 32.0, %v253_v0  ;;  %v280_v4 = vsub.f32 %v279_v1, %v253_v0 }
  0x92   : > { %v295_v5 = vsub.f32 %v293_v2, %v294_v3  ;;  %v281_v6 = vsub.f32 0.0, %v280_v4 }
  0x94   : > { %v296_v7 = vsub.f32 0.0, %v295_v5  ;;  %v300_v10 = vmul.f32 0.9, %v281_v6 }
  0x96   : > { %v297_v8 = vadd.f32 %v296_v7, %v280_v4 }
  0x98   : > { %v299_v9 = vmul.f32 0.032258064, %v297_v8 }
  0x9a   : > { %v301_v11 = vmul.f32 0.1, %v299_v9 }
  0x9c   : > { %v302_v12 = vadd.f32 %v301_v11, %v300_v10 }
  0x9e   : > { %v303_v15 = vmul.f32 %v434_v14, %v302_v12 }
  0xa0   : > { %304 = vst [vmem:[%s215_s26] sm:$0x1] %v303_v15 }
  0xa1   : > { %605 = shalt.err (!%p602_p5)
}
  0xa2   : > { %s606_s7 = scalar_lea.hbm %s318_s13, 16  ;;  %s610_s0 = scalar_lea.hbm %s904_s2, 64 }
  0xa3   : > { %p607_p6 = scmp.ne.s32.totalorder %s318_s13, %s606_s7  ;;  %p611_p10 = scmp.lt.s32.totalorder %s318_s13, %s904_s2 }
  0xa4   : > { %p612_p11 = scmp.lt.s32.totalorder %s610_s0, %s606_s7 }
  0xa5   : > { %p608_p3 = pnand %p607_p6, %p781_p9 }
  0xa6   : > { %p613_p8 = por %p612_p11, %p611_p10 }
  0xa7   : > { %p609_p7 = pneg %p608_p3 }
  0xa9   : > { %p614_p0 = pnand %p613_p8, %p609_p7 }
  0xab   : > { %617 = shalt.err (!%p614_p0)
}
  0xac   : > { %443 = dma.vmem_to_hbm [thread:$0]  (%p781_p9), %s321_s6, 16, %s318_s13, %s306_s27  }
  0xad PF: > { %p457_p1 = scmp.ge.s32.totalorder %s692_s16, 2  ;;  %s332_s23 = sand.u32 1, %s664_s9  }
  0xae   : > { %s333_s11 = scalar_lea.sflag [#allocation4], %s332_s23 }
  0xaf   : > { %p453_p13 = pnand %p457_p1, %p787_p12 }
  0xb1   : > { %p454_p2 = pneg %p453_p13 }
  0xb3   : > { %659 = dma.done.wait (%p454_p2), %s333_s11, 16  }
  0xb4   : > { %661 = vsyncadd (%p454_p2), %s333_s11, 4294967280  ;;  %s21_s16 = sadd.s32 1, %s692_s16   ;;  %s920_s19 = sld [smem:[#allocation11_spill]] }
  0xb5   : > { %p18_p4 = scmp.ge.s32.totalorder %s21_s16, 6   ;;  %s921_s11 = sld [smem:[#allocation14_spill]] }
  0xb6   : > { %s922_s25 = sld [smem:[#allocation12_spill]]  ;;  %s924_s9 = smov %s668_s10 }
  0xb7   : > { %s923_s24 = sld [smem:[#allocation13_spill]]  ;;  %s926_s12 = smov %s684_s14 }
  0xb8   : > { %s927_s13 = smov %s688_s15 }
  0xb9   :  { %20 = sbr.rel (!%p18_p4) target bundleno = 11 (0xb), region = 86 }
  0xba   : > { %s925_s10 = smov %s920_s19 }
  0xbc   : > { %s928_s14 = smov %s922_s25 }
  0xbd   : > { %s929_s15 = smov %s923_s24 }
  0xbe   :  { %337 = vsyncpa [#allocation3], 1 }
  0xbf   :  { %339 = vsyncpa [#allocation3 + $0x1], 1 }
  0xc0   :  { %340 = vsyncpa [#allocation6], 1 }
  0xc1   :  { %342 = vsyncpa [#allocation6 + $0x1], 1 }
  0xc2   :  { %343 = vsyncpa [#allocation4], 1 }
  0xc3   :  { %345 = vsyncpa [#allocation4 + $0x1], 1 }

</bundles_post_ra>
